<compile_context>
chip_gen: v7x
topology: tpu7x:2x2x1
jax: 0.10.0
libtpu: 0.0.40
codegen_flags: <defaults>
</compile_context>

<pallas_src>
import jax
import jax.numpy as jnp
from jax.experimental import pallas as pl
from jax.experimental.pallas import tpu as pltpu

C_IN = 3
C_OUT = 96
KSIZE = 11
STRIDE = 4
KDIM = C_IN * KSIZE * KSIZE          # 363 (unpadded; Mosaic lane-pads in VMEM)
NPAD = 128                           # C_OUT padded to full lane width
BN_EPS = 1e-5
TM_CAP = 4096                        # double-buffered footprint ~6 MB at the cap


def _round_up(x, m):
    return ((x + m - 1) // m) * m


# ----------------------------- Pallas kernel ------------------------------- #
def _s1_kernel(p_ref, w_ref, b_ref, o_ref):
    # p_ref: (tm, 363) bf16 patch tile; w_ref: (363, 128) bf16 (BN scale folded);
    # b_ref: (1, 128) f32 folded bias; o_ref: (tm, 128) bf16.
    acc = jnp.dot(p_ref[...], w_ref[...], preferred_element_type=jnp.float32)
    o_ref[...] = jnp.maximum(acc + b_ref[...], 0.0).astype(o_ref.dtype)


def _choose_tm(m):
    """>=4 grid steps when possible (>=2 per v7x TensorCore), tiles as large as
    possible under a 4096-row cap (VMEM is nowhere near binding)."""
    m128 = _round_up(m, 128)
    if m128 <= 384:
        return 128
    return min(TM_CAP, max(128, ((m128 // 4) // 128) * 128))


def _s1_matmul(patches, w_pad, b_pad):
    m = patches.shape[0]
    tm = _choose_tm(m)
    return pl.pallas_call(
        _s1_kernel,
        out_shape=jax.ShapeDtypeStruct((m, NPAD), jnp.bfloat16),
        grid_spec=pltpu.PrefetchScalarGridSpec(
            num_scalar_prefetch=0,
            grid=(pl.cdiv(m, tm),),
            in_specs=[
                pl.BlockSpec((tm, KDIM), lambda i: (i, 0)),
                pl.BlockSpec((KDIM, NPAD), lambda i: (0, 0)),
                pl.BlockSpec((1, NPAD), lambda i: (0, 0)),
            ],
            out_specs=pl.BlockSpec((tm, NPAD), lambda i: (i, 0)),
        ),
        compiler_params=pltpu.CompilerParams(
            dimension_semantics=("parallel",)),
    )(patches, w_pad, b_pad)


# ------------------------------ JAX glue ----------------------------------- #
def _extract_patches(x):
    """x: (N, 3, H, W) -> ((N*Ho*Wo, 363) bf16, Ho, Wo).

    Feature order is (c, kh, kw), matching PyTorch's conv weight.reshape(Cout, -1).
    """
    n, _, h, w = x.shape
    ho = (h - KSIZE) // STRIDE + 1
    wo = (w - KSIZE) // STRIDE + 1
    p = jax.lax.conv_general_dilated_patches(
        x.astype(jnp.bfloat16),
        filter_shape=(KSIZE, KSIZE),
        window_strides=(STRIDE, STRIDE),
        padding="VALID",
        dimension_numbers=("NCHW", "OIHW", "NHWC"),
    ).reshape(n * ho * wo, KDIM)
    return p, ho, wo


def _to_nchw_f32(rows, n, ho, wo):
    # rows: (m, 128) bf16 -> (n, 96, ho, wo) f32. Slice/reshape/transpose all read
    # bf16; the f32 cast fuses into the same pass (module semantics keep NCHW f32).
    out = rows[:, :C_OUT].reshape(n, ho, wo, C_OUT)
    return out.transpose(0, 3, 1, 2).astype(jnp.float32)


@jax.jit
def _s1_apply_single(x, w_pad, b_pad):
    n = x.shape[0]
    patches, ho, wo = _extract_patches(x)
    rows = _s1_matmul(patches, w_pad, b_pad)
    return _to_nchw_f32(rows, n, ho, wo)


@jax.jit
def _s1_apply_pyramid(xs, w_pad, b_pad):
    # Fuse all pyramid levels into one pallas_call: K and N are identical across
    # levels, so concatenate the patch rows along M and split the result.
    metas, blocks = [], []
    for x in xs:
        p, ho, wo = _extract_patches(x)
        metas.append((x.shape[0], ho, wo, p.shape[0]))
        blocks.append(p)
    patches = blocks[0] if len(blocks) == 1 else jnp.concatenate(blocks, axis=0)
    rows = _s1_matmul(patches, w_pad, b_pad)
    outs, off = [], 0
    for n, ho, wo, mi in metas:
        outs.append(_to_nchw_f32(rows[off:off + mi], n, ho, wo))
        off += mi
    return tuple(outs)


class S1Params:
    """Deterministic parameters for Conv2d(3,96,11,stride=4) + BatchNorm2d(96) (eval)."""

    def __init__(self, key):
        k_w, k_b, k_g, k_beta = jax.random.split(key, 4)
        bound = 1.0 / jnp.sqrt(KDIM)
        self.conv_w = jax.random.uniform(
            k_w, (C_OUT, C_IN, KSIZE, KSIZE), jnp.float32, -bound, bound)
        self.conv_b = jax.random.uniform(
            k_b, (C_OUT,), jnp.float32, -bound, bound)
        self.bn_gamma = jnp.ones((C_OUT,), jnp.float32) + \
            0.01 * jax.random.normal(k_g, (C_OUT,), jnp.float32)
        self.bn_beta = 0.01 * jax.random.normal(k_beta, (C_OUT,), jnp.float32)
        self.bn_mean = jnp.zeros((C_OUT,), jnp.float32)
        self.bn_var = jnp.ones((C_OUT,), jnp.float32)
        self._folded = None

    def folded(self):
        """BN folded into the conv: (w (363,128) bf16, bias (1,128) f32)."""
        if self._folded is None:
            s = self.bn_gamma / jnp.sqrt(self.bn_var + BN_EPS)          # (96,)
            b = (self.conv_b - self.bn_mean) * s + self.bn_beta         # (96,)
            w_km = (self.conv_w.reshape(C_OUT, KDIM) * s[:, None]).T    # (363, 96)
            w_pad = jnp.zeros((KDIM, NPAD), jnp.float32).at[:, :C_OUT].set(w_km)
            b_pad = jnp.zeros((1, NPAD), jnp.float32).at[0, :C_OUT].set(b)
            self._folded = (w_pad.astype(jnp.bfloat16), b_pad)
        return self._folded


def s1_forward(x_pyramid, params):
    """Mirrors S1.forward: accepts a single NCHW array or a list of arrays."""
    w_pad, b_pad = params.folded()
    if isinstance(x_pyramid, list):
        return list(_s1_apply_pyramid(tuple(x_pyramid), w_pad, b_pad))
    return _s1_apply_single(x_pyramid, w_pad, b_pad)


# ------------------------------ reference ---------------------------------- #
def s1_reference_single(x, params):
    y = jax.lax.conv_general_dilated(
        x.astype(jnp.float32), params.conv_w,
        window_strides=(STRIDE, STRIDE), padding="VALID",
        dimension_numbers=("NCHW", "OIHW", "NCHW"))
    y = y + params.conv_b.reshape(1, C_OUT, 1, 1)
    s = params.bn_gamma / jnp.sqrt(params.bn_var + BN_EPS)
    y = (y - params.bn_mean.reshape(1, C_OUT, 1, 1)) * s.reshape(1, C_OUT, 1, 1) \
        + params.bn_beta.reshape(1, C_OUT, 1, 1)
    return jnp.maximum(y, 0.0)


if __name__ == "__main__":
    key = jax.random.PRNGKey(0)
    k_param, k_x1, k_x2 = jax.random.split(key, 3)
    params = S1Params(k_param)

    # Single-tensor input (NCHW): batch=2, 3 channels, 63x63 -> (2, 96, 14, 14)
    x = jax.random.normal(k_x1, (2, 3, 63, 63), jnp.float32)
    out = jax.block_until_ready(s1_forward(x, params))

    ref = s1_reference_single(x, params)
    assert out.shape == ref.shape == (2, 96, 14, 14), out.shape
    # bf16 matmul inputs / bf16 kernel output with f32 accumulation -> loose tol.
    assert jnp.allclose(out, ref, atol=5e-2, rtol=5e-2), \
        float(jnp.max(jnp.abs(out - ref)))

    # Pyramid (list) input path: all levels fused into a single pallas_call.
    x2 = jax.random.normal(k_x2, (2, 3, 51, 51), jnp.float32)
    outs = jax.block_until_ready(s1_forward([x, x2], params))
    assert outs[0].shape == (2, 96, 14, 14)
    assert outs[1].shape == (2, 96, 11, 11)
    ref2 = s1_reference_single(x2, params)
    assert jnp.allclose(outs[0], ref, atol=5e-2, rtol=5e-2), \
        float(jnp.max(jnp.abs(outs[0] - ref)))
    assert jnp.allclose(outs[1], ref2, atol=5e-2, rtol=5e-2), \
        float(jnp.max(jnp.abs(outs[1] - ref2)))

    print("KERNEL_OK")
</pallas_src>

<mosaic_0001>
module attributes {stable_mosaic.version = 11 : i64} {
  func.func @_s1_kernel(%arg0: i32, %arg1: memref<128x363xbf16, #tpu.memory_space<vmem>>, %arg2: memref<363x128xbf16, #tpu.memory_space<vmem>>, %arg3: memref<1x128xf32, #tpu.memory_space<vmem>>, %arg4: memref<128x128xbf16, #tpu.memory_space<vmem>>) attributes {dimension_semantics = [#tpu.dimension_semantics<parallel>], iteration_bounds = array<i64: 4>, scalar_prefetch = 0 : i64, scratch_operands = 0 : i64, tpu.core_type = #tpu.core_type<tc>, window_params = [{transform_indices = @transform_0, window_bounds = array<i64: 128, 363>}, {pipeline_mode = #tpu.pipeline_mode<synchronous>, transform_indices = @transform_1, window_bounds = array<i64: 363, 128>}, {pipeline_mode = #tpu.pipeline_mode<synchronous>, transform_indices = @transform_2, window_bounds = array<i64: 1, 128>}, {transform_indices = @transform_3, window_bounds = array<i64: 128, 128>}]} {
    %c0 = arith.constant 0 : index
    %c0_0 = arith.constant 0 : index
    %0 = vector.load %arg1[%c0, %c0_0] : memref<128x363xbf16, #tpu.memory_space<vmem>>, vector<128x363xbf16>
    %c0_1 = arith.constant 0 : index
    %c0_2 = arith.constant 0 : index
    %1 = vector.load %arg2[%c0_1, %c0_2] : memref<363x128xbf16, #tpu.memory_space<vmem>>, vector<363x128xbf16>
    %cst = arith.constant dense<0.000000e+00> : vector<128x128xf32>
    %2 = tpu.matmul %0, %1, %cst {dimension_numbers = #tpu.dot_dimension_numbers<[1], [0], [0], [1], [0, 0, 1, 1], [], []>} : vector<128x363xbf16>, vector<363x128xbf16>, vector<128x128xf32> -> vector<128x128xf32>
    %c0_3 = arith.constant 0 : index
    %c0_4 = arith.constant 0 : index
    %3 = vector.load %arg3[%c0_3, %c0_4] : memref<1x128xf32, #tpu.memory_space<vmem>>, vector<1x128xf32>
    %4 = vector.broadcast %3 : vector<1x128xf32> to vector<128x128xf32>
    %5 = arith.addf %2, %4 : vector<128x128xf32>
    %cst_5 = arith.constant 0.000000e+00 : f32
    %6 = vector.broadcast %cst_5 : f32 to vector<128x128xf32>
    %7 = arith.maximumf %5, %6 : vector<128x128xf32>
    %8 = arith.truncf %7 : vector<128x128xf32> to vector<128x128xbf16>
    %c0_6 = arith.constant 0 : index
    %c0_7 = arith.constant 0 : index
    %9 = vector.load %arg4[%c0_6, %c0_7] : memref<128x128xbf16, #tpu.memory_space<vmem>>, vector<128x128xbf16>
    tpu.vector_store %arg4[%c0_6, %c0_7], %8 {strides = array<i32>} : memref<128x128xbf16, #tpu.memory_space<vmem>>, vector<128x128xbf16>,
    return
  }
  func.func @transform_0(%arg0: i32) -> (i32, i32) {
    %c0_i32 = arith.constant 0 : i32
    %c0_i32_0 = arith.constant 0 : i32
    return %arg0, %c0_i32 : i32, i32
  }
  func.func @transform_1(%arg0: i32) -> (i32, i32) {
    %c0_i32 = arith.constant 0 : i32
    %c0_i32_0 = arith.constant 0 : i32
    %c0_i32_1 = arith.constant 0 : i32
    return %c0_i32, %c0_i32_0 : i32, i32
  }
  func.func @transform_2(%arg0: i32) -> (i32, i32) {
    %c0_i32 = arith.constant 0 : i32
    %c0_i32_0 = arith.constant 0 : i32
    %c0_i32_1 = arith.constant 0 : i32
    return %c0_i32, %c0_i32_0 : i32, i32
  }
  func.func @transform_3(%arg0: i32) -> (i32, i32) {
    %c0_i32 = arith.constant 0 : i32
    %c0_i32_0 = arith.constant 0 : i32
    return %arg0, %c0_i32 : i32, i32
  }
}

</mosaic_0001>

<bundles_post_ra>
// kernel: _s1_apply_single.1
= control target key start
LH: loop header
LB: loop body
LE: loop exit
PB: predicated region body
PF: predicated region fallthrough
CT: control target
= control target key end

     0   :  { %s1664_s12 = smov 0   ;;  %s1666_s13 = smov 0   ;;  %s1945_s0 = inlined_call_operand.vmem [shape: bf16[392,363], index: 0, kind: input, shape index: {}]   ;;  %s1946_s1 = inlined_call_operand.vmem [shape: bf16[363,128], index: 1, kind: input, shape index: {}]   ;;  %s1947_s2 = inlined_call_operand.vmem [shape: f32[1,128], index: 2, kind: input, shape index: {}]   ;;  %s1948_s3 = inlined_call_operand.vmem [shape: bf16[392,128], index: 3, kind: output, shape index: {}]  }
   0x1   :  { %s1668_s14 = smov 0  }
   0x2 LB: > { %s1677_s15 = sadd.s32 4294967295, %s1609_s14   ;;  %s1679_s16 = sadd.s32 1, %s1609_s14   ;;  %s1609_s14 = sphi %s1668_s14, %s1955_s14   ;;  %s1605_s13 = sphi %s1666_s13, %s1954_s13   ;;  %s1601_s12 = sphi %s1664_s12, %s1953_s12  }
   0x3   : > { %s85_s17 = ssub.s32 %s1609_s14, %s1679_s16  ;;  %s88_s18 = sadd.s32 1, %s1605_s13 }
   0x4   : > { %p86_p0 = scmp.eq.s32.totalorder %s85_s17, 0  ;;  %p98_p1 = scmp.ne.s32.totalorder %s1605_s13, %s1601_s12 }
   0x5   : > { %p99_p2 = scmp.eq.s32.totalorder %s1677_s15, 3  ;;  %p1142_p3 = scmp.ge.s32.totalorder %s1609_s14, 1 }
   0x6   : > { %s1687_s19 = scalar_select %p86_p0, %s1605_s13, %s88_s18  }
   0x7   : > { %p1689_p4 = por %p99_p2, %p98_p1  ;;  %p149_p5 = scmp.lt.s32.totalorder %s1609_s14, 5 }
   0x9   : > { %p150_p6 = pnand %p1142_p3, %p149_p5 }
   0xa   : > { %v1500_v0 = vld [vmem:[%s1946_s1 + $0x40] sm:$0xff] (!%p150_p6)   ;;  %v1502_v2 = vld [vmem:[%s1946_s1 + $0x48] sm:$0xff] (!%p150_p6)   ;;  %v1504_v4 = vld [vmem:[%s1946_s1 + $0x50] sm:$0xff] (!%p150_p6)   ;;  %s1709_s4 = sshll.u32 (!%p150_p6), %s1677_s15, 4  ;;  %vm568_vm0 = vcmask (!%p150_p6), 1044480   ;;  %vm569_vm1 = vcmask (!%p150_p6), 1045504  }
   0xb   : > { %153 = sbr.rel (%p150_p6) target bundleno = 384 (0x180), region = 32  ;;  %v1501_v1 = vld [vmem:[%s1946_s1] sm:$0xff] (!%p150_p6)   ;;  %1301 = vmatprep.subr.bf16.mxu0 (!%p150_p6), %v1500_v0  ;;  %v1503_v3 = vld [vmem:[%s1946_s1 + $0x8] sm:$0xff] (!%p150_p6)   ;;  %v1506_v6 = vld [vmem:[%s1946_s1 + $0x10] sm:$0xff] (!%p150_p6)   ;;  %p184_p7 = scmp.lt.s32.totalorder (!%p150_p6), %s1709_s4, 48  ;;  %v1643_v17 = vmov (!%p150_p6), 65535  }
   0xc   : > { %1302 = vmatpush3.bf16.msra.mxu0 (!%p150_p6), %v1501_v1  ;;  %v1505_v5 = vld [vmem:[%s1946_s1 + $0x80] sm:$0xff] (!%p150_p6)   ;;  %v1507_v7 = vld [vmem:[%s1946_s1 + $0x58] sm:$0xff] (!%p150_p6)   ;;  %v1508_v8 = vld [vmem:[%s1946_s1 + $0x88] sm:$0xff] (!%p150_p6)   ;;  %v570_v18 = vsel (!%p150_p6), %vm568_vm0, 4294967295, %v1643_v17  ;;  %vm543_vm2 = vcmask (!%p150_p6), 875520   ;;  %s175_s8 = sand.u32 (!%p150_p6), 1, %s1601_s12  }
   0xd   : > { %1303 = vmatprep.subr.bf16.mxu0 (!%p150_p6), %v1502_v2  ;;  %1380 = vmatprep.subr.bf16.mxu1 (!%p150_p6), %v1505_v5  ;;  %v1509_v9 = vld [vmem:[%s1946_s1 + $0x18] sm:$0xff] (!%p150_p6)   ;;  %v1511_v10 = vld [vmem:[%s1946_s1 + $0x90] sm:$0xff] (!%p150_p6)   ;;  %v1510_v11 = vld [vmem:[%s1946_s1 + $0x60] sm:$0xff] (!%p150_p6)   ;;  %v571_v23 = vsel (!%p150_p6), %vm569_vm1, %v570_v18, 0  ;;  %s1143_s9 = sshll.u32 (!%p150_p6), %s175_s8, 6 }
   0xe   : > { %1381 = vmatpush3.bf16.msra.mxu1 (!%p150_p6), %v1505_v5  ;;  %v1514_v12 = vld [vmem:[%s1946_s1 + $0x98] sm:$0xff] (!%p150_p6)   ;;  %v1512_v13 = vld [vmem:[%s1946_s1 + $0x20] sm:$0xff] (!%p150_p6)   ;;  %v1513_v14 = vld [vmem:[%s1946_s1 + $0x68] sm:$0xff] (!%p150_p6)   ;;  %s1813_s12 = scalar_lea.vmem (!%p150_p6), [#allocation2], %s1143_s9  }
   0xf   : > { %1382 = vmatprep.subr.bf16.mxu1 (!%p150_p6), %v1508_v8  ;;  %v1517_v15 = vld [vmem:[%s1946_s1 + $0xa0] sm:$0xff] (!%p150_p6)   ;;  %v1515_v16 = vld [vmem:[%s1946_s1 + $0x28] sm:$0xff] (!%p150_p6)   ;;  %v1516_v19 = vld [vmem:[%s1946_s1 + $0x70] sm:$0xff] (!%p150_p6)  }
  0x10   : > { %1304 = vmatpush3.bf16.msra.mxu0 (!%p150_p6), %v1503_v3  ;;  %v1518_v20 = vld [vmem:[%s1946_s1 + $0x30] sm:$0xff] (!%p150_p6)   ;;  %v1520_v21 = vld [vmem:[%s1946_s1 + $0xa8] sm:$0xff] (!%p150_p6)   ;;  %v1519_v22 = vld [vmem:[%s1946_s1 + $0x78] sm:$0xff] (!%p150_p6)  }
  0x11   : > { %1305 = vmatprep.subr.bf16.mxu0 (!%p150_p6), %v1504_v4  ;;  %v1525_v25 = vld [vmem:[%s1946_s1 + $0xb0] sm:$0x3f] (!%p150_p6)   ;;  %v1521_v28 = vld [vmem:[%s1946_s1 + $0x38] sm:$0xff] (!%p150_p6)   ;;  %v1807_v54 = vld [vmem:[%s1947_s2] ss:$0 sm:$0xff] (!%p150_p6) }
  0x12   : > { %s185_s23 = scalar_select %p184_p7, %s1709_s4, 48  ;;  %1383 = vmatpush3.bf16.msra.mxu1 %v1508_v8  ;;  %v573_v27 = vand.u32 %v1525_v25, %v571_v23 }
  0x13   : > { %1384 = vmatprep.subr.bf16.mxu1 %v1511_v10  ;;  %s873_s10 = ssub.s32 (%p1689_p4), 49, %s1709_s4  ;;  %s1251_s11 = sshll.u32 (%p1689_p4), %s1677_s15, 6 }
  0x14   : > { %1306 = vmatpush3.bf16.msra.mxu0 %v1506_v6  ;;  %s1410_s30 = smul.u32 12, %s185_s23  ;;  %p874_p8 = scmp.lt.s32.totalorder (%p1689_p4), %s873_s10, 16 }
  0x15   : > { %1307 = vmatprep.subr.bf16.mxu0 %v1507_v7  ;;  %s1849_s18 = scalar_lea.vmem (%p1689_p4), %s1948_s3, %s1251_s11  }
  0x16   : > { %1385 = vmatpush3.bf16.msra.mxu1 %v1511_v10  ;;  %s1755_s21 = scalar_lea.vmem %s1945_s0, %s1410_s30 }
  0x17   : > { %1386 = vmatprep.subr.bf16.mxu1 %v1514_v12  ;;  %v1524_v24 = vld [vmem:[%s1755_s21 + $0x4] ss:$12 sps:$4 sm:$0xff]   ;;  %v1526_v26 = vld [vmem:[%s1755_s21 + $0x8] ss:$12 sps:$4 sm:$0xff]   ;;  %v1522_v29 = vld [vmem:[%s1755_s21] ss:$12 sps:$4 sm:$0xff]  }
  0x18   : > { %1308 = vmatpush3.bf16.msra.mxu0 %v1509_v9  ;;  %607 = vmatprep.mubr.bf16.mxu0 %v1524_v24  ;;  %v1527_v30 = vld [vmem:[%s1755_s21 + $0x20] ss:$12 sps:$4 sm:$0xff]   ;;  %v1528_v31 = vld [vmem:[%s1755_s21 + $0x1c] ss:$12 sps:$4 sm:$0xff]   ;;  %v1534_v32 = vld [vmem:[%s1755_s21 + $0x38] ss:$12 sps:$4 sm:$0xff]  }
  0x19   : > { %1309 = vmatprep.subr.bf16.mxu0 %v1510_v11  ;;  %1394 = vmatprep.mubr.msk.bf16.mxu1 %vm543_vm2, %v1526_v26  ;;  %v1530_v33 = vld [vmem:[%s1755_s21 + $0x18] ss:$12 sps:$4 sm:$0xff]   ;;  %v1531_v34 = vld [vmem:[%s1755_s21 + $0x34] ss:$12 sps:$4 sm:$0xff]   ;;  %v1535_v35 = vld [vmem:[%s1755_s21 + $0x50] ss:$12 sps:$4 sm:$0xff]  }
  0x1a   : > { %1387 = vmatpush3.bf16.msra.mxu1 %v1514_v12  ;;  %v1542_v36 = vld [vmem:[%s1755_s21 + $0x68] ss:$12 sps:$4 sm:$0xff]   ;;  %v1533_v37 = vld [vmem:[%s1755_s21 + $0x30] ss:$12 sps:$4 sm:$0xff]   ;;  %v1536_v38 = vld [vmem:[%s1755_s21 + $0x4c] ss:$12 sps:$4 sm:$0xff]  }
  0x1b   : > { %1388 = vmatprep.subr.bf16.mxu1 %v1517_v15  ;;  %v1543_v39 = vld [vmem:[%s1755_s21 + $0x80] ss:$12 sps:$4 sm:$0xff]   ;;  %v1550_v40 = vld [vmem:[%s1755_s21 + $0x98] ss:$12 sps:$4 sm:$0xff]   ;;  %v1538_v41 = vld [vmem:[%s1755_s21 + $0x48] ss:$12 sps:$4 sm:$0xff]  }
  0x1c   : > { %1310 = vmatpush3.bf16.msra.mxu0 %v1512_v13  ;;  %v1539_v42 = vld [vmem:[%s1755_s21 + $0x64] ss:$12 sps:$4 sm:$0xff]   ;;  %v1541_v44 = vld [vmem:[%s1755_s21 + $0x60] ss:$12 sps:$4 sm:$0xff]   ;;  %v1544_v45 = vld [vmem:[%s1755_s21 + $0x7c] ss:$12 sps:$4 sm:$0xff]  }
  0x1d   : > { %1311 = vmatprep.subr.bf16.mxu0 %v1513_v14  ;;  %v1551_v43 = vld [vmem:[%s1755_s21 + $0xb0] ss:$12 sps:$4 sm:$0xff]   ;;  %v1546_v46 = vld [vmem:[%s1755_s21 + $0x78] ss:$12 sps:$4 sm:$0xff]   ;;  %v1547_v47 = vld [vmem:[%s1755_s21 + $0x94] ss:$12 sps:$4 sm:$0xff]  }
  0x1e   : > { %1389 = vmatpush3.bf16.msra.mxu1 %v1517_v15  ;;  %v1549_v48 = vld [vmem:[%s1755_s21 + $0x90] ss:$12 sps:$4 sm:$0xff]   ;;  %v1552_v49 = vld [vmem:[%s1755_s21 + $0xac] ss:$12 sps:$4 sm:$0xff]   ;;  %v1554_v50 = vld [vmem:[%s1755_s21 + $0xa8] ss:$12 sps:$4 sm:$0xff]  }
  0x1f   : > { %1390 = vmatprep.subr.bf16.mxu1 %v1520_v21 }
  0x20   : > { %1312 = vmatpush3.bf16.msra.mxu0 %v1515_v16 }
  0x21   : > { %1313 = vmatprep.subr.bf16.mxu0 %v1516_v19 }
  0x22   : > { %1391 = vmatpush3.bf16.msra.mxu1 %v1520_v21 }
  0x23   : > { %1392 = vmatprep.subr.bf16.mxu1 %v573_v27 }
  0x24   : > { %1314 = vmatpush3.bf16.msra.mxu0 %v1518_v20 }
  0x25   : > { %1315 = vmatprep.subr.bf16.mxu0 %v1519_v22 }
  0x26   : > { %1393 = vmatpush3.bf16.msra.mxu1 %v573_v27 }
  0x28   : > { %1316 = vmatpush3.bf16.msra.mxu0 %v1521_v28 }
  0x29   : > { %1395 = vmatmul.mubr.msk.bf16.vlgmr.msra.gmra.mrb[0].mxu1 %vm543_vm2, %v1527_v30 }
  0x2a   : > { %1398 = vmatprep.mubr.msk.bf16.mxu1 %vm543_vm2, %v1534_v32 }
  0x2b   : > { %608 = vmatmul.mubr.bf16.vlgmr.msra.gmra.mrb[0].mxu0 %v1522_v29 }
  0x2c   : > { %615 = vmatprep.mubr.bf16.mxu0 %v1528_v31 }
  0x31   : > { %1399 = vmatmul.mubr.msk.bf16.gmra.mrb[4].mxu1 %vm543_vm2, %v1535_v35 }
  0x32   : > { %1402 = vmatprep.mubr.msk.bf16.mxu1 %vm543_vm2, %v1542_v36 }
  0x33   : > { %616 = vmatmul.mubr.bf16.gmra.mrb[4].mxu0 %v1530_v33 }
  0x34   : > { %623 = vmatprep.mubr.bf16.mxu0 %v1531_v34 }
  0x39   : > { %1403 = vmatmul.mubr.msk.bf16.gmra.mrb[8].mxu1 %vm543_vm2, %v1543_v39 }
  0x3a   : > { %1406 = vmatprep.mubr.msk.bf16.mxu1 %vm543_vm2, %v1550_v40 }
  0x3b   : > { %624 = vmatmul.mubr.bf16.gmra.mrb[8].mxu0 %v1533_v37 }
  0x3c   : > { %631 = vmatprep.mubr.bf16.mxu0 %v1536_v38 }
  0x41   : > { %1407 = vmatmul.mubr.msk.bf16.gmra.mrb[12].mxu1 %vm543_vm2, %v1551_v43 }
  0x43   : > { %632 = vmatmul.mubr.bf16.gmra.mrb[12].mxu0 %v1538_v41 }
  0x44   : > { %639 = vmatprep.mubr.bf16.mxu0 %v1539_v42 }
  0x4b   : > { %640 = vmatmul.mubr.bf16.gmra.mrb[16].mxu0 %v1541_v44 }
  0x4c   : > { %647 = vmatprep.mubr.bf16.mxu0 %v1544_v45 }
  0x53   : > { %648 = vmatmul.mubr.bf16.gmra.mrb[20].mxu0 %v1546_v46 }
  0x54   : > { %655 = vmatprep.mubr.bf16.mxu0 %v1547_v47 }
  0x5b   : > { %656 = vmatmul.mubr.bf16.gmra.mrb[24].mxu0 %v1549_v48 }
  0x5c   : > { %663 = vmatprep.mubr.bf16.mxu0 %v1552_v49 }
  0x63   : > { %664 = vmatmul.mubr.bf16.gmra.mrb[28].mxu0 %v1554_v50 }
  0xfc   : > { %v1396_v53 = vpop.f32.mrb[0].mxu1 }
  0xfd   : > { %v706_v57 = vpop.f32.mrb[1].mxu1 }
  0xfe   : > { %v1317_v51 = vpop.f32.mrb[0].mxu0  ;;  %v1397_v59 = vpop.f32.mrb[2].mxu1 }
  0xff   : > { %v1318_v52 = vpop.f32.mrb[1].mxu0  ;;  %v709_v62 = vpop.f32.mrb[3].mxu1 }
 0x100   : > { %v1319_v55 = vadd.f32 %v1318_v52, %v1317_v51  ;;  %v1320_v56 = vpop.f32.mrb[2].mxu0 }
 0x101   : > { %v1321_v58 = vpop.f32.mrb[3].mxu0 }
 0x102   : > { %v1322_v60 = vadd.f32 %v1321_v58, %v1320_v56  ;;  %v610_v61 = vadd.f32 %v1319_v55, %v1807_v54 }
 0x104   : > { %v707_v63 = vadd.f32 %v706_v57, %v610_v61  ;;  %v613_v0 = vadd.f32 %v1322_v60, %v1807_v54  ;;  %v1400_v4 = vpop.f32.mrb[4].mxu1 }
 0x105   : > { %v722_v9 = vpop.f32.mrb[5].mxu1 }
 0x106   : > { %v710_v1 = vadd.f32 %v709_v62, %v613_v0  ;;  %v1323_v2 = vpop.f32.mrb[4].mxu0  ;;  %v769_v5 = vmax.f32 %v707_v63, 0.0  ;;  %v1401_v11 = vpop.f32.mrb[6].mxu1 }
 0x107   : > { %v1324_v3 = vpop.f32.mrb[5].mxu0  ;;  %v725_v15 = vpop.f32.mrb[7].mxu1 }
 0x108   : > { %v770_v6 = vmax.f32 %v710_v1, 0.0  ;;  %v1325_v7 = vadd.f32 %v1324_v3, %v1323_v2  ;;  %v1326_v8 = vpop.f32.mrb[6].mxu0 }
 0x109   : > { %v1327_v10 = vpop.f32.mrb[7].mxu0 }
 0x10a   : > { %v1257_v12 = vpack.c.bf16 %v770_v6, %v769_v5  ;;  %v618_v13 = vadd.f32 %v1325_v7, %v1807_v54  ;;  %v1328_v14 = vadd.f32 %v1327_v10, %v1326_v8 }
 0x10c   : > { %1258 = vst [vmem:[%s1813_s12] sm:$0xff] %v1257_v12   ;;  %v715_v16 = vadd.f32 %v1396_v53, %v618_v13  ;;  %v621_v17 = vadd.f32 %v1328_v14, %v1807_v54  ;;  %v1404_v21 = vpop.f32.mrb[8].mxu1 }
 0x10d   : > { %v738_v26 = vpop.f32.mrb[9].mxu1 }
 0x10e   : > { %v718_v18 = vadd.f32 %v1397_v59, %v621_v17  ;;  %v1329_v19 = vpop.f32.mrb[8].mxu0  ;;  %v771_v22 = vmax.f32 %v715_v16, 0.0  ;;  %v1405_v28 = vpop.f32.mrb[10].mxu1 }
 0x10f   : > { %v1330_v20 = vpop.f32.mrb[9].mxu0  ;;  %v741_v32 = vpop.f32.mrb[11].mxu1 }
 0x110   : > { %v772_v23 = vmax.f32 %v718_v18, 0.0  ;;  %v1331_v24 = vadd.f32 %v1330_v20, %v1329_v19  ;;  %v1332_v25 = vpop.f32.mrb[10].mxu0 }
 0x111   : > { %v1333_v27 = vpop.f32.mrb[11].mxu0 }
 0x112   : > { %v1262_v29 = vpack.c.bf16 %v772_v23, %v771_v22  ;;  %v1334_v30 = vadd.f32 %v1333_v27, %v1332_v25  ;;  %v626_v31 = vadd.f32 %v1331_v24, %v1807_v54 }
 0x114   : > { %1294 = vst [vmem:[%s1813_s12 + $0x8] sm:$0xff] %v1262_v29   ;;  %v723_v33 = vadd.f32 %v722_v9, %v626_v31  ;;  %v629_v34 = vadd.f32 %v1334_v30, %v1807_v54  ;;  %v1820_v38 = vpop.f32.mrb[12].mxu1 }
 0x115   : > { %v754_v43 = vpop.f32.mrb[13].mxu1 }
 0x116   : > { %v726_v35 = vadd.f32 %v725_v15, %v629_v34  ;;  %v1335_v36 = vpop.f32.mrb[12].mxu0  ;;  %v773_v39 = vmax.f32 %v723_v33, 0.0  ;;  %v1822_v45 = vpop.f32.mrb[14].mxu1 }
 0x117   : > { %v1336_v37 = vpop.f32.mrb[13].mxu0  ;;  %v757_v49 = vpop.f32.mrb[15].mxu1 }
 0x118   : > { %v774_v40 = vmax.f32 %v726_v35, 0.0  ;;  %v1337_v41 = vadd.f32 %v1336_v37, %v1335_v36  ;;  %v1338_v42 = vpop.f32.mrb[14].mxu0 }
 0x119   : > { %v1339_v44 = vpop.f32.mrb[15].mxu0 }
 0x11a   : > { %v1267_v46 = vpack.c.bf16 %v774_v40, %v773_v39  ;;  %v634_v47 = vadd.f32 %v1337_v41, %v1807_v54  ;;  %v1340_v48 = vadd.f32 %v1339_v44, %v1338_v42 }
 0x11c   : > { %1295 = vst [vmem:[%s1813_s12 + $0x10] sm:$0xff] %v1267_v46   ;;  %v731_v50 = vadd.f32 %v1400_v4, %v634_v47  ;;  %v637_v51 = vadd.f32 %v1340_v48, %v1807_v54 }
 0x11e   : > { %v734_v52 = vadd.f32 %v1401_v11, %v637_v51  ;;  %v1341_v53 = vpop.f32.mrb[16].mxu0  ;;  %v775_v56 = vmax.f32 %v731_v50, 0.0 }
 0x11f   : > { %v1342_v55 = vpop.f32.mrb[17].mxu0 }
 0x120   : > { %v776_v57 = vmax.f32 %v734_v52, 0.0  ;;  %v1343_v58 = vadd.f32 %v1342_v55, %v1341_v53  ;;  %v1344_v59 = vpop.f32.mrb[18].mxu0 }
 0x121   : > { %v1345_v60 = vpop.f32.mrb[19].mxu0 }
 0x122   : > { %v1272_v61 = vpack.c.bf16 %v776_v57, %v775_v56  ;;  %v1346_v62 = vadd.f32 %v1345_v60, %v1344_v59  ;;  %v642_v63 = vadd.f32 %v1343_v58, %v1807_v54 }
 0x124   : > { %1296 = vst [vmem:[%s1813_s12 + $0x18] sm:$0xff] %v1272_v61   ;;  %v739_v0 = vadd.f32 %v738_v26, %v642_v63  ;;  %v645_v1 = vadd.f32 %v1346_v62, %v1807_v54 }
 0x126   : > { %v742_v2 = vadd.f32 %v741_v32, %v645_v1  ;;  %v1347_v3 = vpop.f32.mrb[20].mxu0  ;;  %v777_v5 = vmax.f32 %v739_v0, 0.0 }
 0x127   : > { %v1348_v4 = vpop.f32.mrb[21].mxu0 }
 0x128   : > { %v778_v6 = vmax.f32 %v742_v2, 0.0  ;;  %v1349_v7 = vadd.f32 %v1348_v4, %v1347_v3  ;;  %v1350_v8 = vpop.f32.mrb[22].mxu0 }
 0x129   : > { %v1351_v9 = vpop.f32.mrb[23].mxu0 }
 0x12a   : > { %v1277_v10 = vpack.c.bf16 %v778_v6, %v777_v5  ;;  %v650_v11 = vadd.f32 %v1349_v7, %v1807_v54  ;;  %v1352_v12 = vadd.f32 %v1351_v9, %v1350_v8 }
 0x12c   : > { %1297 = vst [vmem:[%s1813_s12 + $0x20] sm:$0xff] %v1277_v10   ;;  %v747_v13 = vadd.f32 %v1404_v21, %v650_v11  ;;  %v653_v14 = vadd.f32 %v1352_v12, %v1807_v54 }
 0x12e   : > { %v750_v15 = vadd.f32 %v1405_v28, %v653_v14  ;;  %v1353_v16 = vpop.f32.mrb[24].mxu0  ;;  %v779_v18 = vmax.f32 %v747_v13, 0.0 }
 0x12f   : > { %v1354_v17 = vpop.f32.mrb[25].mxu0 }
 0x130   : > { %v780_v19 = vmax.f32 %v750_v15, 0.0  ;;  %v1355_v20 = vadd.f32 %v1354_v17, %v1353_v16  ;;  %v1356_v22 = vpop.f32.mrb[26].mxu0 }
 0x131   : > { %v1357_v23 = vpop.f32.mrb[27].mxu0 }
 0x132   : > { %v1282_v24 = vpack.c.bf16 %v780_v19, %v779_v18  ;;  %v1358_v25 = vadd.f32 %v1357_v23, %v1356_v22  ;;  %v658_v26 = vadd.f32 %v1355_v20, %v1807_v54 }
 0x134   : > { %1298 = vst [vmem:[%s1813_s12 + $0x28] sm:$0xff] %v1282_v24   ;;  %v755_v27 = vadd.f32 %v754_v43, %v658_v26  ;;  %v661_v29 = vadd.f32 %v1358_v25, %v1807_v54 }
 0x136   : > { %v758_v21 = vadd.f32 %v757_v49, %v661_v29  ;;  %v1359_v30 = vpop.f32.mrb[28].mxu0  ;;  %v781_v28 = vmax.f32 %v755_v27, 0.0 }
 0x137   : > { %v1360_v31 = vpop.f32.mrb[29].mxu0 }
 0x138   : > { %v782_v32 = vmax.f32 %v758_v21, 0.0  ;;  %v1361_v33 = vadd.f32 %v1360_v31, %v1359_v30  ;;  %v1362_v34 = vpop.f32.mrb[30].mxu0 }
 0x139   : > { %v1363_v35 = vpop.f32.mrb[31].mxu0 }
 0x13a   : > { %v1287_v36 = vpack.c.bf16 %v782_v32, %v781_v28  ;;  %v666_v37 = vadd.f32 %v1361_v33, %v1807_v54  ;;  %v1364_v39 = vadd.f32 %v1363_v35, %v1362_v34 }
 0x13c   : > { %1299 = vst [vmem:[%s1813_s12 + $0x30] sm:$0xff] %v1287_v36   ;;  %v763_v40 = vadd.f32 %v1820_v38, %v666_v37  ;;  %v669_v41 = vadd.f32 %v1364_v39, %v1807_v54 }
 0x13e   : > { %v766_v42 = vadd.f32 %v1822_v45, %v669_v41  ;;  %v783_v43 = vmax.f32 %v763_v40, 0.0  ;;  %871 = sbr.rel (!%p1689_p4) target bundleno = 384 (0x180), region = 36 }
 0x140   : > { %v784_v44 = vmax.f32 %v766_v42, 0.0 }
 0x142   : > { %v1292_v46 = vpack.c.bf16 %v784_v44, %v783_v43 }
 0x144   : > { %1300 = vst [vmem:[%s1813_s12 + $0x38] sm:$0xff] %v1292_v46  }
 0x145   : > { %s1957_s10 = smov (!%p874_p8, %s873_s10), 16 }
 0x146   : > { %s1220_s21 = sshll.u32 %s1957_s10, 6 }
 0x147   : > { %p1223_p9 = scmp.eq.s32.totalorder %s1220_s21, 0 }
 0x148   : > { %s1855_s22 = sshrl.u32 (!%p1223_p9), %s1957_s10, 4 }
 0x149   : > { %882 = sbr.rel (%p1223_p9) target bundleno = 384 (0x180), region = 40  ;;  %p1224_p10 = scmp.le.s32.totalorder (!%p1223_p9), %s1855_s22, 0 }
 0x150   : > { %1095 = sbr.rel (%p1224_p10) target bundleno = 363 (0x16b), region = 112  ;;  %s1950_s15 = smov (!%p1224_p10), %s1849_s18 }
 0x151   : > { %s1951_s20 = smov (!%p1224_p10), %s1813_s12  ;;  %s1864_s4 = smov (!%p1224_p10), 0  }
 0x152   : > { %s1866_s23 = smov (!%p1224_p10), 0  }
 0x157 LB: >> { %v898_v54 = vld [vmem:[%s1617_s20] sm:$0xf]  ;;  %v900_v38 = vld [vmem:[%s1617_s20 + $0x4] sm:$0xf]  ;;  %v902_v45 = vld [vmem:[%s1617_s20 + $0x8] sm:$0xf]  ;;  %s1625_s23 = sphi %s1866_s23, %s892_s23   ;;  %s1621_s4 = sphi %s1864_s4, %s1952_s4   ;;  %s1617_s20 = sphi %s1951_s20, %s935_s20   ;;  %s1613_s15 = sphi %s1950_s15, %s936_s15  }
 0x158   : >> { %899 = vst [vmem:[%s1613_s15] sm:$0xf] %v898_v54  ;;  %901 = vst [vmem:[%s1613_s15 + $0x4] sm:$0xf] %v900_v38  ;;  %v904_v47 = vld [vmem:[%s1617_s20 + $0xc] sm:$0xf]  ;;  %s930_s24 = sadd.s32 1, %s1621_s4 }
 0x159   : >> { %903 = vst [vmem:[%s1613_s15 + $0x8] sm:$0xf] %v902_v45  ;;  %v906_v48 = vld [vmem:[%s1617_s20 + $0x10] sm:$0xf]  ;;  %v908_v49 = vld [vmem:[%s1617_s20 + $0x14] sm:$0xf]  ;;  %p931_p11 = scmp.ge.s32.totalorder %s930_s24, %s1855_s22 }
 0x15a   : >> { %905 = vst [vmem:[%s1613_s15 + $0xc] sm:$0xf] %v904_v47  ;;  %907 = vst [vmem:[%s1613_s15 + $0x10] sm:$0xf] %v906_v48  ;;  %v910_v50 = vld [vmem:[%s1617_s20 + $0x18] sm:$0xf] }
 0x15b   : >> { %909 = vst [vmem:[%s1613_s15 + $0x14] sm:$0xf] %v908_v49  ;;  %v912_v51 = vld [vmem:[%s1617_s20 + $0x1c] sm:$0xf]  ;;  %v914_v52 = vld [vmem:[%s1617_s20 + $0x20] sm:$0xf] }
 0x15c   : >> { %911 = vst [vmem:[%s1613_s15 + $0x18] sm:$0xf] %v910_v50  ;;  %913 = vst [vmem:[%s1613_s15 + $0x1c] sm:$0xf] %v912_v51  ;;  %v916_v53 = vld [vmem:[%s1617_s20 + $0x24] sm:$0xf] }
 0x15d   : >> { %915 = vst [vmem:[%s1613_s15 + $0x20] sm:$0xf] %v914_v52  ;;  %v918_v55 = vld [vmem:[%s1617_s20 + $0x28] sm:$0xf]  ;;  %v920_v56 = vld [vmem:[%s1617_s20 + $0x2c] sm:$0xf] }
 0x15e   : >> { %917 = vst [vmem:[%s1613_s15 + $0x24] sm:$0xf] %v916_v53  ;;  %919 = vst [vmem:[%s1613_s15 + $0x28] sm:$0xf] %v918_v55  ;;  %v922_v57 = vld [vmem:[%s1617_s20 + $0x30] sm:$0xf] }
 0x15f   : >> { %921 = vst [vmem:[%s1613_s15 + $0x2c] sm:$0xf] %v920_v56  ;;  %v924_v58 = vld [vmem:[%s1617_s20 + $0x34] sm:$0xf]  ;;  %v926_v59 = vld [vmem:[%s1617_s20 + $0x38] sm:$0xf] }
 0x160   : >> { %923 = vst [vmem:[%s1613_s15 + $0x30] sm:$0xf] %v922_v57  ;;  %925 = vst [vmem:[%s1613_s15 + $0x34] sm:$0xf] %v924_v58  ;;  %v928_v60 = vld [vmem:[%s1617_s20 + $0x3c] sm:$0xf] }
 0x161   : >> { %927 = vst [vmem:[%s1613_s15 + $0x38] sm:$0xf] %v926_v59  ;;  %929 = vst [vmem:[%s1613_s15 + $0x3c] sm:$0xf] %v928_v60  ;;  %s1959_s24 = smov (%p931_p11, %s930_s24), 0  ;;  %s892_s23 = sadd.s32 1, %s1625_s23  }
 0x162   : >> { %s1225_s25 = sshll.u32 %s1959_s24, 6  ;;  %p891_p12 = scmp.ge.s32.totalorder %s892_s23, %s1855_s22 }
 0x163   : >> { %s935_s20 = scalar_lea.vmem %s1813_s12, %s1225_s25 [#allocation2]   ;;  %s936_s15 = scalar_lea.vmem %s1849_s18, %s1225_s25  }
 0x164   : >> { %s1952_s4 = smov %s1959_s24  ;;  %894 = sbr.rel (!%p891_p12) target bundleno = 343 (0x157), region = 118 }
 0x16b PF: > { %s1927_s26 = sand.u32 15, %s1957_s10   ;;  %s1252_s27 = sshll.u32 %s1855_s22, 6 }
 0x16c   : > { %s941_s28 = scalar_lea.vmem %s1813_s12, %s1252_s27 [#allocation2]   ;;  %s943_s29 = scalar_lea.vmem %s1849_s18, %s1252_s27  }
 0x16d   : > { %p1230_p13 = scmp.le.s32.totalorder %s1927_s26, 0 }
 0x16e   : > { %s1627_s30 = smov (!%p1230_p13), %s943_s29   ;;  %s1631_s5 = smov (!%p1230_p13), %s941_s28  }
 0x16f   : > { %1109 = sbr.rel (%p1230_p13) target bundleno = 384 (0x180), region = 123  ;;  %s1635_s6 = smov (!%p1230_p13), 0  }
 0x170   : > { %s1639_s7 = smov (!%p1230_p13), 0  }
 0x176 LB: >> { %v953_v61 = vld [vmem:[%s1633_s5] sm:$0xf]  ;;  %s955_s8 = sadd.s32 1, %s1637_s6  ;;  %s947_s7 = sadd.s32 1, %s1641_s7   ;;  %s1641_s7 = sphi %s1639_s7, %s947_s7   ;;  %s1637_s6 = sphi %s1635_s6, %s1636_s6   ;;  %s1633_s5 = sphi %s1631_s5, %s960_s5   ;;  %s1629_s30 = sphi %s1627_s30, %s961_s30  }
 0x177   : >> { %954 = vst [vmem:[%s1629_s30] sm:$0xf] %v953_v61  ;;  %p956_p0 = scmp.ge.s32.totalorder %s955_s8, %s1927_s26  ;;  %p946_p1 = scmp.ge.s32.totalorder %s947_s7, %s1927_s26 }
 0x179   : >> { %s1961_s8 = smov (%p956_p0, %s955_s8), 0  ;;  %949 = sbr.rel (!%p946_p1) target bundleno = 374 (0x176), region = 129 }
 0x17a   : >> { %s1231_s9 = sshll.u32 %s1961_s8, 2  ;;  %s1636_s6 = smov %s1961_s8  }
 0x17b   : >> { %s960_s5 = scalar_lea.vmem %s941_s28, %s1231_s9 [#allocation2]   ;;  %s961_s30 = scalar_lea.vmem %s943_s29, %s1231_s9  }
 0x180 PF: > { %p10_p2 = scmp.ge.s32.totalorder %s1679_s16, 6   ;;  %s1953_s12 = smov %s1605_s13 }
 0x181   : > { %s1954_s13 = smov %s1687_s19  ;;  %s1955_s14 = smov %s1679_s16 }
 0x182   :  { %12 = sbr.rel (!%p10_p2) target bundleno = 2 (0x2), region = 140 }

</bundles_post_ra>
